<compile_context>
chip_gen: v5e
topology: v5e:2x2
jax: 0.10.0
libtpu: 0.0.40
codegen_flags: <defaults>
</compile_context>

<pallas_src>
import jax
import jax.numpy as jnp
from jax.experimental import pallas as pl
from jax.experimental.pallas import tpu as pltpu


def _prefix_concat_dma_kernel(task_ids_ref, table_hbm, in_hbm, out_hbm, sems):
    """DMA-only gather + concat.

    task_ids_ref : SMEM  [B]                 int32
    table_hbm    : HBM   [num_tasks, P, E]
    in_hbm       : HBM   [B, T, E]
    out_hbm      : HBM   [B, P + T, E]
    sems         : DMA semaphores [2]  (0: prompt copies, 1: input copy)
    """
    num_tasks, P, _ = table_hbm.shape
    B, T, _ = in_hbm.shape

    # ---- Phase 1: issue everything, keep all DMAs in flight -------------
    # Single coalesced strided copy for all input rows (bulk of the bytes):
    #   in_hbm[b, t, e] -> out_hbm[b, P + t, e]   for all b, t, e.
    input_cp = pltpu.make_async_copy(
        in_hbm,
        out_hbm.at[:, pl.ds(P, T), :],
        sems.at[1])
    input_cp.start()

    # Per-batch gathered prompt copies (tiny, issue-rate bound -> unrolled).
    for b in range(B):
        tid = task_ids_ref[b]
        # Clamp on the scalar path where the address is formed (OOB guard).
        tid = jnp.minimum(jnp.maximum(tid, 0), num_tasks - 1)
        pltpu.make_async_copy(
            table_hbm.at[tid],
            out_hbm.at[b, pl.ds(0, P), :],
            sems.at[0]).start()

    # ---- Phase 2: wait --------------------------------------------------
    # Waits only need the semaphore + (static) transfer size; use a constant
    # -index descriptor so no SMEM scalar reads sit in the completion tail.
    prompt_wait = pltpu.make_async_copy(
        table_hbm.at[0],
        out_hbm.at[0, pl.ds(0, P), :],
        sems.at[0])
    for _ in range(B):
        prompt_wait.wait()
    input_cp.wait()


def prefix_tuning_forward(input_embedding, task_table, task_ids,
                          layer_idx=0, prompt_layer_indices=(0,),
                          prompt_len=None):
    """Pallas implementation of PrefixTuning.forward.

    Args:
      input_embedding: [B, T, E]
      task_table:      [num_tasks, P, E]  (stacked task_embeddings_dic values,
                                           row i == task id i)
      task_ids:        [B] int (or None -> zeros, as in the PyTorch module)
    Returns:
      [B, P+T, E] if the prompt is applied at this layer, else input_embedding.
    """
    B, T, E = input_embedding.shape
    num_tasks, P, E2 = task_table.shape
    assert E == E2, "embed dims must match"
    assert input_embedding.dtype == task_table.dtype, "dtypes must match (DMA copy)"
    if prompt_len is None:
        prompt_len = P

    # DMA-efficiency alignment guarantees (full-rate, >=512B-aligned rows).
    itemsize = jnp.dtype(input_embedding.dtype).itemsize
    sublane_pack = 32 // itemsize          # 8 f32 / 16 bf16 / 32 int8
    assert E % 128 == 0, "E must be a multiple of 128 lanes for full-rate DMA"
    assert P % sublane_pack == 0, "P must be a multiple of the dtype sublane pack"
    assert T % sublane_pack == 0, "T must be a multiple of the dtype sublane pack"

    # Early-exit branches of the PyTorch forward (pure Python control flow).
    # NOTE: like the original module, prompt_len is only used for the ==0
    # check; the stored table's full P rows are always prepended.
    if prompt_len == 0 or layer_idx not in prompt_layer_indices:
        return input_embedding
    if task_ids is None:
        task_ids = jnp.zeros((B,), dtype=jnp.int32)
    task_ids = task_ids.astype(jnp.int32)  # clamped inside the kernel

    total_bytes = 2 * B * (P + T) * E * itemsize  # read + write, pure HBM traffic
    return pl.pallas_call(
        _prefix_concat_dma_kernel,
        out_shape=jax.ShapeDtypeStruct((B, P + T, E), input_embedding.dtype),
        in_specs=[
            pl.BlockSpec(memory_space=pltpu.MemorySpace.SMEM),  # task_ids
            pl.BlockSpec(memory_space=pl.ANY),                  # task_table (HBM)
            pl.BlockSpec(memory_space=pl.ANY),                  # input_embedding (HBM)
        ],
        out_specs=pl.BlockSpec(memory_space=pl.ANY),            # output (HBM)
        scratch_shapes=[pltpu.SemaphoreType.DMA((2,))],
        cost_estimate=pl.CostEstimate(
            flops=0, transcendentals=0, bytes_accessed=total_bytes),
    )(task_ids, task_table, input_embedding)


if __name__ == "__main__":
    # Small shapes consistent with the module:
    #   B=2 batch, T=16 input seq, P=8 prompt length, E=128 embed, 3 tasks.
    B, T, P, E, NUM_TASKS = 2, 16, 8, 128, 3

    key = jax.random.PRNGKey(0)
    k_tab, k_in = jax.random.split(key)

    # Deterministic "learnable" task prompt embeddings (task_embeddings_dic,
    # stacked so that row i corresponds to task id i).
    task_table = jax.random.normal(k_tab, (NUM_TASKS, P, E), dtype=jnp.float32)
    # Input embedding [B, T, E].
    input_embedding = jax.random.normal(k_in, (B, T, E), dtype=jnp.float32)
    # Task ids per batch element.
    task_ids = jnp.array([2, 0], dtype=jnp.int32)

    out = prefix_tuning_forward(
        input_embedding, task_table, task_ids,
        layer_idx=0, prompt_layer_indices=(0,), prompt_len=P)
    out = jax.block_until_ready(out)

    # Reference (plain JAX) check of the gather + concat semantics.
    ref = jnp.concatenate([task_table[task_ids], input_embedding], axis=1)
    assert out.shape == (B, P + T, E)
    assert jnp.allclose(out, ref), "mismatch vs reference"

    # task_ids=None path (defaults to task 0 for every batch element).
    out0 = prefix_tuning_forward(
        input_embedding, task_table, None,
        layer_idx=0, prompt_layer_indices=(0,), prompt_len=P)
    out0 = jax.block_until_ready(out0)
    ref0 = jnp.concatenate(
        [jnp.broadcast_to(task_table[0], (B, P, E)), input_embedding], axis=1)
    assert jnp.allclose(out0, ref0), "mismatch vs reference (task_ids=None)"

    # Layer-skip branch returns the input unchanged.
    skipped = prefix_tuning_forward(
        input_embedding, task_table, task_ids,
        layer_idx=3, prompt_layer_indices=(0,), prompt_len=P)
    assert skipped is input_embedding

    print("KERNEL_OK")
</pallas_src>

<mosaic_0001>
module attributes {stable_mosaic.version = 11 : i64} {
  func.func @_prefix_concat_dma_kernel(%arg0: memref<2xi32, #tpu.memory_space<smem>>, %arg1: memref<3x8x128xf32, #tpu.memory_space<any>>, %arg2: memref<2x16x128xf32, #tpu.memory_space<any>>, %arg3: memref<2x24x128xf32, #tpu.memory_space<any>>, %arg4: memref<2x!tpu.dma_semaphore, #tpu.memory_space<semaphore_mem>>) attributes {dimension_semantics = [], scalar_prefetch = 0 : i64, scratch_operands = 1 : i64, tpu.core_type = #tpu.core_type<tc>} {
    %c1_i32 = arith.constant 1 : i32
    %c0_i32 = arith.constant 0 : i32
    %c8_i32 = arith.constant 8 : i32
    %c0_i32_0 = arith.constant 0 : i32
    %0 = tpu.memref_slice %arg3[%c0_i32, %c8_i32, %c0_i32_0] : memref<2x24x128xf32, #tpu.memory_space<any>> -> memref<2x16x128xf32, #tpu.memory_space<any>>
    %1 = tpu.memref_slice %arg4[%c1_i32] : memref<2x!tpu.dma_semaphore, #tpu.memory_space<semaphore_mem>> -> memref<1x!tpu.dma_semaphore, #tpu.memory_space<semaphore_mem>>
    %2 = tpu.memref_squeeze %1 : memref<1x!tpu.dma_semaphore, #tpu.memory_space<semaphore_mem>> -> memref<!tpu.dma_semaphore, #tpu.memory_space<semaphore_mem>>
    tpu.enqueue_dma source(%arg2 : memref<2x16x128xf32, #tpu.memory_space<any>>) target(%0 : memref<2x16x128xf32, #tpu.memory_space<any>>) target_semaphore(%2 : memref<!tpu.dma_semaphore, #tpu.memory_space<semaphore_mem>>)
    %c0 = arith.constant 0 : index
    %3 = memref.load %arg0[%c0] : memref<2xi32, #tpu.memory_space<smem>>
    %c0_i32_1 = arith.constant 0 : i32
    %4 = arith.maxsi %3, %c0_i32_1 : i32
    %c2_i32 = arith.constant 2 : i32
    %5 = arith.minsi %4, %c2_i32 : i32
    %c0_i32_2 = arith.constant 0 : i32
    %c0_i32_3 = arith.constant 0 : i32
    %c0_i32_4 = arith.constant 0 : i32
    %c0_i32_5 = arith.constant 0 : i32
    %6 = tpu.memref_slice %arg1[%5, %c0_i32_4, %c0_i32_5] : memref<3x8x128xf32, #tpu.memory_space<any>> -> memref<1x8x128xf32, #tpu.memory_space<any>>
    %7 = tpu.memref_squeeze %6 : memref<1x8x128xf32, #tpu.memory_space<any>> -> memref<8x128xf32, #tpu.memory_space<any>>
    %c0_i32_6 = arith.constant 0 : i32
    %c0_i32_7 = arith.constant 0 : i32
    %8 = tpu.memref_slice %arg3[%c0_i32_2, %c0_i32_6, %c0_i32_7] : memref<2x24x128xf32, #tpu.memory_space<any>> -> memref<1x8x128xf32, #tpu.memory_space<any>>
    %9 = tpu.memref_squeeze %8 : memref<1x8x128xf32, #tpu.memory_space<any>> -> memref<8x128xf32, #tpu.memory_space<any>>
    %10 = tpu.memref_slice %arg4[%c0_i32_3] : memref<2x!tpu.dma_semaphore, #tpu.memory_space<semaphore_mem>> -> memref<1x!tpu.dma_semaphore, #tpu.memory_space<semaphore_mem>>
    %11 = tpu.memref_squeeze %10 : memref<1x!tpu.dma_semaphore, #tpu.memory_space<semaphore_mem>> -> memref<!tpu.dma_semaphore, #tpu.memory_space<semaphore_mem>>
    tpu.enqueue_dma source(%7 : memref<8x128xf32, #tpu.memory_space<any>>) target(%9 : memref<8x128xf32, #tpu.memory_space<any>>) target_semaphore(%11 : memref<!tpu.dma_semaphore, #tpu.memory_space<semaphore_mem>>)
    %c1 = arith.constant 1 : index
    %12 = memref.load %arg0[%c1] : memref<2xi32, #tpu.memory_space<smem>>
    %c0_i32_8 = arith.constant 0 : i32
    %13 = arith.maxsi %12, %c0_i32_8 : i32
    %c2_i32_9 = arith.constant 2 : i32
    %14 = arith.minsi %13, %c2_i32_9 : i32
    %c1_i32_10 = arith.constant 1 : i32
    %c0_i32_11 = arith.constant 0 : i32
    %c0_i32_12 = arith.constant 0 : i32
    %c0_i32_13 = arith.constant 0 : i32
    %15 = tpu.memref_slice %arg1[%14, %c0_i32_12, %c0_i32_13] : memref<3x8x128xf32, #tpu.memory_space<any>> -> memref<1x8x128xf32, #tpu.memory_space<any>>
    %16 = tpu.memref_squeeze %15 : memref<1x8x128xf32, #tpu.memory_space<any>> -> memref<8x128xf32, #tpu.memory_space<any>>
    %c0_i32_14 = arith.constant 0 : i32
    %c0_i32_15 = arith.constant 0 : i32
    %17 = tpu.memref_slice %arg3[%c1_i32_10, %c0_i32_14, %c0_i32_15] : memref<2x24x128xf32, #tpu.memory_space<any>> -> memref<1x8x128xf32, #tpu.memory_space<any>>
    %18 = tpu.memref_squeeze %17 : memref<1x8x128xf32, #tpu.memory_space<any>> -> memref<8x128xf32, #tpu.memory_space<any>>
    %19 = tpu.memref_slice %arg4[%c0_i32_11] : memref<2x!tpu.dma_semaphore, #tpu.memory_space<semaphore_mem>> -> memref<1x!tpu.dma_semaphore, #tpu.memory_space<semaphore_mem>>
    %20 = tpu.memref_squeeze %19 : memref<1x!tpu.dma_semaphore, #tpu.memory_space<semaphore_mem>> -> memref<!tpu.dma_semaphore, #tpu.memory_space<semaphore_mem>>
    tpu.enqueue_dma source(%16 : memref<8x128xf32, #tpu.memory_space<any>>) target(%18 : memref<8x128xf32, #tpu.memory_space<any>>) target_semaphore(%20 : memref<!tpu.dma_semaphore, #tpu.memory_space<semaphore_mem>>)
    %c0_i32_16 = arith.constant 0 : i32
    %c0_i32_17 = arith.constant 0 : i32
    %c0_i32_18 = arith.constant 0 : i32
    %c0_i32_19 = arith.constant 0 : i32
    %c0_i32_20 = arith.constant 0 : i32
    %21 = tpu.memref_slice %arg1[%c0_i32_16, %c0_i32_19, %c0_i32_20] : memref<3x8x128xf32, #tpu.memory_space<any>> -> memref<1x8x128xf32, #tpu.memory_space<any>>
    %22 = tpu.memref_squeeze %21 : memref<1x8x128xf32, #tpu.memory_space<any>> -> memref<8x128xf32, #tpu.memory_space<any>>
    %c0_i32_21 = arith.constant 0 : i32
    %c0_i32_22 = arith.constant 0 : i32
    %23 = tpu.memref_slice %arg3[%c0_i32_17, %c0_i32_21, %c0_i32_22] : memref<2x24x128xf32, #tpu.memory_space<any>> -> memref<1x8x128xf32, #tpu.memory_space<any>>
    %24 = tpu.memref_squeeze %23 : memref<1x8x128xf32, #tpu.memory_space<any>> -> memref<8x128xf32, #tpu.memory_space<any>>
    %25 = tpu.memref_slice %arg4[%c0_i32_18] : memref<2x!tpu.dma_semaphore, #tpu.memory_space<semaphore_mem>> -> memref<1x!tpu.dma_semaphore, #tpu.memory_space<semaphore_mem>>
    %26 = tpu.memref_squeeze %25 : memref<1x!tpu.dma_semaphore, #tpu.memory_space<semaphore_mem>> -> memref<!tpu.dma_semaphore, #tpu.memory_space<semaphore_mem>>
    tpu.wait_dma2 semaphore(%26 : memref<!tpu.dma_semaphore, #tpu.memory_space<semaphore_mem>>) src(%22 : memref<8x128xf32, #tpu.memory_space<any>>) dst(%24 : memref<8x128xf32, #tpu.memory_space<any>>)
    %c0_i32_23 = arith.constant 0 : i32
    %c0_i32_24 = arith.constant 0 : i32
    %c0_i32_25 = arith.constant 0 : i32
    %c0_i32_26 = arith.constant 0 : i32
    %c0_i32_27 = arith.constant 0 : i32
    %27 = tpu.memref_slice %arg1[%c0_i32_23, %c0_i32_26, %c0_i32_27] : memref<3x8x128xf32, #tpu.memory_space<any>> -> memref<1x8x128xf32, #tpu.memory_space<any>>
    %28 = tpu.memref_squeeze %27 : memref<1x8x128xf32, #tpu.memory_space<any>> -> memref<8x128xf32, #tpu.memory_space<any>>
    %c0_i32_28 = arith.constant 0 : i32
    %c0_i32_29 = arith.constant 0 : i32
    %29 = tpu.memref_slice %arg3[%c0_i32_24, %c0_i32_28, %c0_i32_29] : memref<2x24x128xf32, #tpu.memory_space<any>> -> memref<1x8x128xf32, #tpu.memory_space<any>>
    %30 = tpu.memref_squeeze %29 : memref<1x8x128xf32, #tpu.memory_space<any>> -> memref<8x128xf32, #tpu.memory_space<any>>
    %31 = tpu.memref_slice %arg4[%c0_i32_25] : memref<2x!tpu.dma_semaphore, #tpu.memory_space<semaphore_mem>> -> memref<1x!tpu.dma_semaphore, #tpu.memory_space<semaphore_mem>>
    %32 = tpu.memref_squeeze %31 : memref<1x!tpu.dma_semaphore, #tpu.memory_space<semaphore_mem>> -> memref<!tpu.dma_semaphore, #tpu.memory_space<semaphore_mem>>
    tpu.wait_dma2 semaphore(%32 : memref<!tpu.dma_semaphore, #tpu.memory_space<semaphore_mem>>) src(%28 : memref<8x128xf32, #tpu.memory_space<any>>) dst(%30 : memref<8x128xf32, #tpu.memory_space<any>>)
    %c1_i32_30 = arith.constant 1 : i32
    %c0_i32_31 = arith.constant 0 : i32
    %c8_i32_32 = arith.constant 8 : i32
    %c0_i32_33 = arith.constant 0 : i32
    %33 = tpu.memref_slice %arg3[%c0_i32_31, %c8_i32_32, %c0_i32_33] : memref<2x24x128xf32, #tpu.memory_space<any>> -> memref<2x16x128xf32, #tpu.memory_space<any>>
    %34 = tpu.memref_slice %arg4[%c1_i32_30] : memref<2x!tpu.dma_semaphore, #tpu.memory_space<semaphore_mem>> -> memref<1x!tpu.dma_semaphore, #tpu.memory_space<semaphore_mem>>
    %35 = tpu.memref_squeeze %34 : memref<1x!tpu.dma_semaphore, #tpu.memory_space<semaphore_mem>> -> memref<!tpu.dma_semaphore, #tpu.memory_space<semaphore_mem>>
    tpu.wait_dma2 semaphore(%35 : memref<!tpu.dma_semaphore, #tpu.memory_space<semaphore_mem>>) src(%arg2 : memref<2x16x128xf32, #tpu.memory_space<any>>) dst(%33 : memref<2x16x128xf32, #tpu.memory_space<any>>)
    return
  }
}

</mosaic_0001>

<bundles_post_ra>
// kernel: tpu_custom_call.1
= control target key start
LH: loop header
LB: loop body
LE: loop exit
PB: predicated region body
PF: predicated region fallthrough
CT: control target
= control target key end

     0   :  { %8 = vsyncpa [#allocation4], 0  ;;  %s154_s15 = smov [#allocation3]   ;;  %s208_s0 = inlined_call_operand.hbm [shape: s32[2], index: 0, kind: input, shape index: {}]   ;;  %s209_s1 = inlined_call_operand.hbm [shape: f32[3,8,128], index: 1, kind: input, shape index: {}]   ;;  %s210_s2 = inlined_call_operand.hbm [shape: f32[2,16,128], index: 2, kind: input, shape index: {}]   ;;  %s211_s3 = inlined_call_operand.hbm [shape: f32[2,24,128], index: 3, kind: output, shape index: {}]  }
   0x1   :  { %s14_s14 = sshll.u32 %s208_s0, 4  ;;  %s15_s14 = int_to_ptr.hbm [resolvable:$true] %s14_s14 }
   0x2   :  { %17 = dma.hbm_to_smem %s15_s14, 16, %s154_s15, [#allocation4]  }
   0x3   :  { %148 = dma.done.wait [#allocation4], 16  }
   0x4   :  { %149 = vsyncadd [#allocation4], 4294967280 }
   0x5   :  { %22 = sfence }
   0x6   :  { %s23_s18 = scalar_lea.hbm %s211_s3, 8  ;;  %s29_s21 = sshll.u32 %s210_s2, 4  ;;  %s30_s21 = int_to_ptr.hbm [resolvable:$true] %s29_s21 }
   0x7   :  { %s31_s22 = sshll.u32 %s23_s18, 4  ;;  %s155_s23 = smov 256   ;;  %s32_s22 = int_to_ptr.hbm [resolvable:$true] %s31_s22 }
   0x8   :  { %36 = sst [smem:[#allocation6]] %s155_s23  ;;  %s156_s0 = smov 384  }
   0x9   :  { %38 = sst [smem:[#allocation6 + $0x1]] %s156_s0  ;;  %s157_s24 = smov 16  }
   0xa   :  { %40 = sst [smem:[#allocation6 + $0x2]] %s157_s24  ;;  %s158_s25 = smov [#allocation2 + $0x1]  }
   0xb   :  { %s159_s26 = smov [#allocation5]   ;;  %s160_s27 = smov 0  }
   0xc   :  { %42 = dma.general %s30_s21, 512, %s32_s22, %s158_s25, %s159_s26, [#allocation6], %s160_s27, 0  }
   0xd   :  { %s43_s28 = sld [smem:[#allocation3]]  ;;  %s56_s2 = sshll.u32 %s211_s3, 4  ;;  %s57_s2 = int_to_ptr.hbm [resolvable:$true] %s56_s2 }
   0xe   :  { %s161_s9 = smov [#allocation2]   ;;  %s162_s10 = smov [#allocation7]  }
   0xf   :  { %s68_s14 = scalar_lea.hbm %s211_s3, 24  ;;  %s163_s21 = smov [#allocation9]  }
  0x10   :  { %s75_s15 = sshll.u32 %s68_s14, 4  ;;  %s76_s15 = int_to_ptr.hbm [resolvable:$true] %s75_s15 }
  0x13   :  { %p44_p0 = scmp.gt.s32.totalorder %s43_s28, 0  ;;  %p107_p1 = scmp.lt.s32.totalorder %s43_s28, 2 }
  0x15   :  { %s213_s28 = smov (!%p44_p0, %s43_s28), 0 }
  0x16   :  { %s215_s28 = smov (!%p107_p1, %s213_s28), 2 }
  0x17   :  { %s112_s4 = sshll.u32 %s215_s28, 3 }
  0x18   :  { %s49_s7 = scalar_lea.hbm %s209_s1, %s112_s4 }
  0x19   :  { %s54_s8 = sshll.u32 %s49_s7, 4  ;;  %s55_s8 = int_to_ptr.hbm [resolvable:$true] %s54_s8 }
  0x1a   :  { %60 = dma.general %s55_s8, 128, %s57_s2, %s161_s9, %s162_s10, [#allocation8], %s160_s27, 0  }
  0x1b   :  { %s113_s11 = sld [smem:[#allocation3 + $0x1]] }
  0x21   :  { %p62_p2 = scmp.gt.s32.totalorder %s113_s11, 0  ;;  %p114_p3 = scmp.lt.s32.totalorder %s113_s11, 2 }
  0x23   :  { %s217_s11 = smov (!%p62_p2, %s113_s11), 0 }
  0x24   :  { %s219_s11 = smov (!%p114_p3, %s217_s11), 2 }
  0x25   :  { %s119_s16 = sshll.u32 %s219_s11, 3 }
  0x26   :  { %s67_s19 = scalar_lea.hbm %s209_s1, %s119_s16 }
  0x27   :  { %s73_s20 = sshll.u32 %s67_s19, 4  ;;  %s74_s20 = int_to_ptr.hbm [resolvable:$true] %s73_s20 }
  0x28   :  { %79 = dma.general %s74_s20, 128, %s76_s15, %s161_s9, %s163_s21, [#allocation10], %s160_s27, 0  }
  0x29   :  { %150 = dma.done.wait [#allocation2], 256 }
  0x2a   :  { %151 = vsyncadd [#allocation2], 4294967040 }
  0x2b   :  { %152 = dma.done.wait [#allocation2 + $0x1], 512 }
  0x2c   :  { %153 = vsyncadd [#allocation2 + $0x1], 4294966784 }
  0x2d   :  { %89 = vsyncpa [#allocation4], 1 }
  0x2e   :  { %90 = vsyncmov [#allocation2] }
  0x31   :  { %s91_s3 = vpop.sfrf %90 }
  0x32   :  { %p120_p4 = scmp.ne.s32.totalorder %s91_s3, 0 }
  0x34   :  { %95 = shalt.err (%p120_p4)  }
  0x35   :  { %97 = vsyncmov [#allocation2 + $0x1] }
  0x38   :  { %s98_s22 = vpop.sfrf %97 }
  0x39   :  { %p121_p5 = scmp.ne.s32.totalorder %s98_s22, 0 }
  0x3b   :  { %102 = shalt.err (%p121_p5)  }

</bundles_post_ra>
